<compile_context>
chip_gen: v6e
topology: v6e:2x2x1
jax: 0.10.0
libtpu: 0.0.40
codegen_flags: <defaults>
</compile_context>

<pallas_src>
import math

import jax
import jax.numpy as jnp
from jax.experimental import pallas as pl
from jax.experimental.pallas import tpu as pltpu

# ---- module hyperparameters (match PyTorch defaults) -----------------------
INPUT_DIM = 256 + 32               # 288
HIDDEN = [100, 100]
HIDDEN_PAD = 128                   # lane-aligned hidden width
NBR_GAUSS = 5
OUT_DIM = 32
TEMP = 1.0
HEAD_VM = NBR_GAUSS * OUT_DIM      # 160 (var block width == mean block width)
HEAD_DIM = NBR_GAUSS + 2 * HEAD_VM # 325

DEFAULT_TILE_B = 512


def _round_up(x, m):
    return ((x + m - 1) // m) * m


# ---------------------------------------------------------------------------
# Kernel
# ---------------------------------------------------------------------------
def _mdn_kernel(x_ref, w1_ref, b1_ref, w2_ref, b2_ref,
                wc_ref, bc_ref, wv_ref, bv_ref, wm_ref, bm_ref,
                coeff_ref, mean_ref, var_ref):
    x = x_ref[...]                                               # bf16 [TB, 288]

    # layer 0: Linear(288 -> 128 padded) + ReLU
    h = jnp.dot(x, w1_ref[...], preferred_element_type=jnp.float32) + b1_ref[...]
    h = jnp.maximum(h, 0.0).astype(jnp.bfloat16)

    # layer 1: Linear(128 -> 128 padded) + ReLU
    h = jnp.dot(h, w2_ref[...], preferred_element_type=jnp.float32) + b2_ref[...]
    h = jnp.maximum(h, 0.0).astype(jnp.bfloat16)

    # head, split into three lane-aligned matmuls from the same resident h.
    # coeff: softmax over NBR_GAUSS logits (dim=1)
    logits = (jnp.dot(h, wc_ref[...], preferred_element_type=jnp.float32)
              + bc_ref[...]) * (1.0 / TEMP)
    m = jnp.max(logits, axis=1, keepdims=True)
    e = jnp.exp(logits - m)
    coeff_ref[...] = e * pl.reciprocal(jnp.sum(e, axis=1, keepdims=True),
                                       approx=True)

    # variances: exp(.) * temp
    v = jnp.dot(h, wv_ref[...], preferred_element_type=jnp.float32) + bv_ref[...]
    var_ref[...] = jnp.exp(v) * TEMP

    # means
    mean_ref[...] = (jnp.dot(h, wm_ref[...], preferred_element_type=jnp.float32)
                     + bm_ref[...])


# ---------------------------------------------------------------------------
# Wrapper
# ---------------------------------------------------------------------------
def mdn_forward(x, prepared_params, *, tile_b=DEFAULT_TILE_B):
    """x: [B, INPUT_DIM] float32.

    Returns (coeff [B, NG], mean [B, NG, OD], var [B, NG, OD]), matching the
    PyTorch MDN.forward output ordering and reshapes.
    """
    w1, b1, w2, b2, wc, bc, wv, bv, wm, bm = prepared_params
    B = x.shape[0]

    tb = min(tile_b, _round_up(B, 8))
    Bp = _round_up(B, tb)

    xb = x.astype(jnp.bfloat16)
    if Bp != B:
        xb = jnp.pad(xb, ((0, Bp - B), (0, 0)))

    def resident(shape):
        # weights/biases: same block every step -> DMA'd once, stay in VMEM
        return pl.BlockSpec(shape, lambda i: (0, 0))

    grid = (Bp // tb,)
    coeff, mean_flat, var_flat = pl.pallas_call(
        _mdn_kernel,
        out_shape=(
            jax.ShapeDtypeStruct((Bp, NBR_GAUSS), jnp.float32),
            jax.ShapeDtypeStruct((Bp, HEAD_VM), jnp.float32),
            jax.ShapeDtypeStruct((Bp, HEAD_VM), jnp.float32),
        ),
        grid=grid,
        in_specs=[
            pl.BlockSpec((tb, INPUT_DIM), lambda i: (i, 0)),   # x (tiled)
            resident(w1.shape), resident(b1.shape),
            resident(w2.shape), resident(b2.shape),
            resident(wc.shape), resident(bc.shape),
            resident(wv.shape), resident(bv.shape),
            resident(wm.shape), resident(bm.shape),
        ],
        out_specs=(
            pl.BlockSpec((tb, NBR_GAUSS), lambda i: (i, 0)),
            pl.BlockSpec((tb, HEAD_VM), lambda i: (i, 0)),
            pl.BlockSpec((tb, HEAD_VM), lambda i: (i, 0)),
        ),
        compiler_params=pltpu.CompilerParams(
            dimension_semantics=("parallel",)),
    )(xb, w1, b1, w2, b2, wc, bc, wv, bv, wm, bm)

    coeff = coeff[:B]
    mean = mean_flat[:B].reshape(B, NBR_GAUSS, OUT_DIM)
    var = var_flat[:B].reshape(B, NBR_GAUSS, OUT_DIM)
    return coeff, mean, var


# ---------------------------------------------------------------------------
# Parameter construction / preparation
# ---------------------------------------------------------------------------
def init_raw_params(key):
    """Xavier-uniform weights stored [in, out] (transposed vs PyTorch), zero biases."""
    dims = [INPUT_DIM] + HIDDEN + [HEAD_DIM]
    params = []
    keys = jax.random.split(key, len(dims) - 1)
    for k, fan_in, fan_out in zip(keys, dims[:-1], dims[1:]):
        bound = math.sqrt(6.0 / (fan_in + fan_out))
        w = jax.random.uniform(k, (fan_in, fan_out), jnp.float32, -bound, bound)
        b = jnp.zeros((1, fan_out), jnp.float32)
        params.extend([w, b])
    return tuple(params)


def prepare_params(raw_params):
    """Pad hidden width to 128, split the head [coeff|var|mean], cast weights to bf16."""
    w1, b1, w2, b2, w3, b3 = raw_params
    h0, h1 = HIDDEN  # 100, 100

    # layer 0: [288,100] -> [288,128]
    w1p = jnp.pad(w1, ((0, 0), (0, HIDDEN_PAD - h0))).astype(jnp.bfloat16)
    b1p = jnp.pad(b1, ((0, 0), (0, HIDDEN_PAD - h0)))

    # layer 1: [100,100] -> [128,128]
    w2p = jnp.pad(w2, ((0, HIDDEN_PAD - h0), (0, HIDDEN_PAD - h1))).astype(jnp.bfloat16)
    b2p = jnp.pad(b2, ((0, 0), (0, HIDDEN_PAD - h1)))

    # head: split columns in the original [coeff | var | mean] order, pad rows.
    def pad_rows(w):
        return jnp.pad(w, ((0, HIDDEN_PAD - h1), (0, 0))).astype(jnp.bfloat16)

    wc = pad_rows(w3[:, :NBR_GAUSS])
    wv = pad_rows(w3[:, NBR_GAUSS:NBR_GAUSS + HEAD_VM])
    wm = pad_rows(w3[:, NBR_GAUSS + HEAD_VM:])
    bc = b3[:, :NBR_GAUSS]
    bv = b3[:, NBR_GAUSS:NBR_GAUSS + HEAD_VM]
    bm = b3[:, NBR_GAUSS + HEAD_VM:]

    return (w1p, b1p, w2p, b2p, wc, bc, wv, bv, wm, bm)


# ---------------------------------------------------------------------------
# Pure-JAX reference (same bf16 matmul inputs as the kernel) for validation
# ---------------------------------------------------------------------------
def mdn_reference(x, raw_params):
    w1, b1, w2, b2, w3, b3 = raw_params
    bf = jnp.bfloat16
    h = jnp.dot(x.astype(bf), w1.astype(bf), preferred_element_type=jnp.float32) + b1
    h = jnp.maximum(h, 0.0)
    h = jnp.dot(h.astype(bf), w2.astype(bf), preferred_element_type=jnp.float32) + b2
    h = jnp.maximum(h, 0.0)
    o = jnp.dot(h.astype(bf), w3.astype(bf), preferred_element_type=jnp.float32) + b3
    coeff = jax.nn.softmax(o[:, :NBR_GAUSS] / TEMP, axis=1)
    var = jnp.exp(o[:, NBR_GAUSS:NBR_GAUSS + HEAD_VM]) * TEMP
    mean = o[:, NBR_GAUSS + HEAD_VM:]
    B = x.shape[0]
    return coeff, mean.reshape(B, NBR_GAUSS, OUT_DIM), var.reshape(B, NBR_GAUSS, OUT_DIM)


if __name__ == "__main__":
    key = jax.random.PRNGKey(0)
    k_param, k_x = jax.random.split(key)

    raw_params = init_raw_params(k_param)
    params = prepare_params(raw_params)

    B = 8
    x = jax.random.normal(k_x, (B, INPUT_DIM), jnp.float32)

    fwd = jax.jit(mdn_forward)
    coeff, mean, var = fwd(x, params)
    jax.block_until_ready((coeff, mean, var))

    assert coeff.shape == (B, NBR_GAUSS)
    assert mean.shape == (B, NBR_GAUSS, OUT_DIM)
    assert var.shape == (B, NBR_GAUSS, OUT_DIM)

    # softmax rows sum to ~1 (approx reciprocal -> looser tol), variances positive
    assert jnp.allclose(jnp.sum(coeff, axis=1), 1.0, atol=5e-3)
    assert bool(jnp.all(var > 0))

    # compare against a pure-JAX reference using the same bf16 matmul inputs
    r_coeff, r_mean, r_var = mdn_reference(x, raw_params)
    assert jnp.allclose(coeff, r_coeff, atol=5e-3)
    assert jnp.allclose(mean, r_mean, rtol=1e-2, atol=1e-2)
    assert jnp.allclose(var, r_var, rtol=1e-2, atol=1e-2)

    print("KERNEL_OK")
</pallas_src>

<mosaic_0001>
module attributes {stable_mosaic.version = 11 : i64} {
  func.func @_mdn_kernel(%arg0: i32, %arg1: memref<8x288xbf16, #tpu.memory_space<vmem>>, %arg2: memref<288x128xbf16, #tpu.memory_space<vmem>>, %arg3: memref<1x128xf32, #tpu.memory_space<vmem>>, %arg4: memref<128x128xbf16, #tpu.memory_space<vmem>>, %arg5: memref<1x128xf32, #tpu.memory_space<vmem>>, %arg6: memref<128x5xbf16, #tpu.memory_space<vmem>>, %arg7: memref<1x5xf32, #tpu.memory_space<vmem>>, %arg8: memref<128x160xbf16, #tpu.memory_space<vmem>>, %arg9: memref<1x160xf32, #tpu.memory_space<vmem>>, %arg10: memref<128x160xbf16, #tpu.memory_space<vmem>>, %arg11: memref<1x160xf32, #tpu.memory_space<vmem>>, %arg12: memref<8x5xf32, #tpu.memory_space<vmem>>, %arg13: memref<8x160xf32, #tpu.memory_space<vmem>>, %arg14: memref<8x160xf32, #tpu.memory_space<vmem>>) attributes {dimension_semantics = [#tpu.dimension_semantics<parallel>], iteration_bounds = array<i64: 1>, scalar_prefetch = 0 : i64, scratch_operands = 0 : i64, tpu.core_type = #tpu.core_type<tc>, window_params = [{transform_indices = @transform_0, window_bounds = array<i64: 8, 288>}, {pipeline_mode = #tpu.pipeline_mode<synchronous>, transform_indices = @transform_1, window_bounds = array<i64: 288, 128>}, {pipeline_mode = #tpu.pipeline_mode<synchronous>, transform_indices = @transform_2, window_bounds = array<i64: 1, 128>}, {pipeline_mode = #tpu.pipeline_mode<synchronous>, transform_indices = @transform_3, window_bounds = array<i64: 128, 128>}, {pipeline_mode = #tpu.pipeline_mode<synchronous>, transform_indices = @transform_4, window_bounds = array<i64: 1, 128>}, {pipeline_mode = #tpu.pipeline_mode<synchronous>, transform_indices = @transform_5, window_bounds = array<i64: 128, 5>}, {pipeline_mode = #tpu.pipeline_mode<synchronous>, transform_indices = @transform_6, window_bounds = array<i64: 1, 5>}, {pipeline_mode = #tpu.pipeline_mode<synchronous>, transform_indices = @transform_7, window_bounds = array<i64: 128, 160>}, {pipeline_mode = #tpu.pipeline_mode<synchronous>, transform_indices = @transform_8, window_bounds = array<i64: 1, 160>}, {pipeline_mode = #tpu.pipeline_mode<synchronous>, transform_indices = @transform_9, window_bounds = array<i64: 128, 160>}, {pipeline_mode = #tpu.pipeline_mode<synchronous>, transform_indices = @transform_10, window_bounds = array<i64: 1, 160>}, {transform_indices = @transform_11, window_bounds = array<i64: 8, 5>}, {transform_indices = @transform_12, window_bounds = array<i64: 8, 160>}, {transform_indices = @transform_13, window_bounds = array<i64: 8, 160>}]} {
    %c0 = arith.constant 0 : index
    %c0_0 = arith.constant 0 : index
    %0 = vector.load %arg1[%c0, %c0_0] : memref<8x288xbf16, #tpu.memory_space<vmem>>, vector<8x288xbf16>
    %c0_1 = arith.constant 0 : index
    %c0_2 = arith.constant 0 : index
    %1 = vector.load %arg2[%c0_1, %c0_2] : memref<288x128xbf16, #tpu.memory_space<vmem>>, vector<288x128xbf16>
    %cst = arith.constant dense<0.000000e+00> : vector<8x128xf32>
    %2 = tpu.matmul %0, %1, %cst {dimension_numbers = #tpu.dot_dimension_numbers<[1], [0], [0], [1], [0, 0, 1, 1], [], []>} : vector<8x288xbf16>, vector<288x128xbf16>, vector<8x128xf32> -> vector<8x128xf32>
    %c0_3 = arith.constant 0 : index
    %c0_4 = arith.constant 0 : index
    %3 = vector.load %arg3[%c0_3, %c0_4] : memref<1x128xf32, #tpu.memory_space<vmem>>, vector<1x128xf32>
    %4 = vector.broadcast %3 : vector<1x128xf32> to vector<8x128xf32>
    %5 = arith.addf %2, %4 : vector<8x128xf32>
    %cst_5 = arith.constant 0.000000e+00 : f32
    %6 = vector.broadcast %cst_5 : f32 to vector<8x128xf32>
    %7 = arith.maximumf %5, %6 : vector<8x128xf32>
    %8 = arith.truncf %7 : vector<8x128xf32> to vector<8x128xbf16>
    %c0_6 = arith.constant 0 : index
    %c0_7 = arith.constant 0 : index
    %9 = vector.load %arg4[%c0_6, %c0_7] : memref<128x128xbf16, #tpu.memory_space<vmem>>, vector<128x128xbf16>
    %cst_8 = arith.constant dense<0.000000e+00> : vector<8x128xf32>
    %10 = tpu.matmul %8, %9, %cst_8 {dimension_numbers = #tpu.dot_dimension_numbers<[1], [0], [0], [1], [0, 0, 1, 1], [], []>} : vector<8x128xbf16>, vector<128x128xbf16>, vector<8x128xf32> -> vector<8x128xf32>
    %c0_9 = arith.constant 0 : index
    %c0_10 = arith.constant 0 : index
    %11 = vector.load %arg5[%c0_9, %c0_10] : memref<1x128xf32, #tpu.memory_space<vmem>>, vector<1x128xf32>
    %12 = vector.broadcast %11 : vector<1x128xf32> to vector<8x128xf32>
    %13 = arith.addf %10, %12 : vector<8x128xf32>
    %cst_11 = arith.constant 0.000000e+00 : f32
    %14 = vector.broadcast %cst_11 : f32 to vector<8x128xf32>
    %15 = arith.maximumf %13, %14 : vector<8x128xf32>
    %16 = arith.truncf %15 : vector<8x128xf32> to vector<8x128xbf16>
    %c0_12 = arith.constant 0 : index
    %c0_13 = arith.constant 0 : index
    %17 = vector.load %arg6[%c0_12, %c0_13] : memref<128x5xbf16, #tpu.memory_space<vmem>>, vector<128x5xbf16>
    %cst_14 = arith.constant dense<0.000000e+00> : vector<8x5xf32>
    %18 = tpu.matmul %16, %17, %cst_14 {dimension_numbers = #tpu.dot_dimension_numbers<[1], [0], [0], [1], [0, 0, 1, 1], [], []>} : vector<8x128xbf16>, vector<128x5xbf16>, vector<8x5xf32> -> vector<8x5xf32>
    %c0_15 = arith.constant 0 : index
    %c0_16 = arith.constant 0 : index
    %19 = vector.load %arg7[%c0_15, %c0_16] : memref<1x5xf32, #tpu.memory_space<vmem>>, vector<1x5xf32>
    %20 = vector.broadcast %19 : vector<1x5xf32> to vector<8x5xf32>
    %21 = arith.addf %18, %20 : vector<8x5xf32>
    %cst_17 = arith.constant 1.000000e+00 : f32
    %22 = vector.broadcast %cst_17 : f32 to vector<8x5xf32>
    %23 = arith.mulf %21, %22 : vector<8x5xf32>
    %cst_18 = arith.constant dense<0xFF800000> : vector<8xf32>
    %24 = vector.multi_reduction <maximumf>, %23, %cst_18 [1] : vector<8x5xf32> to vector<8xf32>
    %25 = vector.shape_cast %24 : vector<8xf32> to vector<8x1xf32>
    %26 = vector.broadcast %25 : vector<8x1xf32> to vector<8x5xf32>
    %27 = arith.subf %23, %26 : vector<8x5xf32>
    %28 = math.exp %27 : vector<8x5xf32>
    %cst_19 = arith.constant dense<0.000000e+00> : vector<8xf32>
    %29 = vector.multi_reduction <add>, %28, %cst_19 [1] : vector<8x5xf32> to vector<8xf32>
    %30 = vector.shape_cast %29 : vector<8xf32> to vector<8x1xf32>
    %31 = tpu.reciprocal %30 {approx = true} : vector<8x1xf32> -> vector<8x1xf32>
    %32 = vector.broadcast %31 : vector<8x1xf32> to vector<8x5xf32>
    %33 = arith.mulf %28, %32 : vector<8x5xf32>
    %c0_20 = arith.constant 0 : index
    %c0_21 = arith.constant 0 : index
    %34 = vector.load %arg12[%c0_20, %c0_21] : memref<8x5xf32, #tpu.memory_space<vmem>>, vector<8x5xf32>
    tpu.vector_store %arg12[%c0_20, %c0_21], %33 {strides = array<i32>} : memref<8x5xf32, #tpu.memory_space<vmem>>, vector<8x5xf32>,
    %c0_22 = arith.constant 0 : index
    %c0_23 = arith.constant 0 : index
    %35 = vector.load %arg8[%c0_22, %c0_23] : memref<128x160xbf16, #tpu.memory_space<vmem>>, vector<128x160xbf16>
    %cst_24 = arith.constant dense<0.000000e+00> : vector<8x160xf32>
    %36 = tpu.matmul %16, %35, %cst_24 {dimension_numbers = #tpu.dot_dimension_numbers<[1], [0], [0], [1], [0, 0, 1, 1], [], []>} : vector<8x128xbf16>, vector<128x160xbf16>, vector<8x160xf32> -> vector<8x160xf32>
    %c0_25 = arith.constant 0 : index
    %c0_26 = arith.constant 0 : index
    %37 = vector.load %arg9[%c0_25, %c0_26] : memref<1x160xf32, #tpu.memory_space<vmem>>, vector<1x160xf32>
    %38 = vector.broadcast %37 : vector<1x160xf32> to vector<8x160xf32>
    %39 = arith.addf %36, %38 : vector<8x160xf32>
    %40 = math.exp %39 : vector<8x160xf32>
    %cst_27 = arith.constant 1.000000e+00 : f32
    %41 = vector.broadcast %cst_27 : f32 to vector<8x160xf32>
    %42 = arith.mulf %40, %41 : vector<8x160xf32>
    %c0_28 = arith.constant 0 : index
    %c0_29 = arith.constant 0 : index
    %43 = vector.load %arg14[%c0_28, %c0_29] : memref<8x160xf32, #tpu.memory_space<vmem>>, vector<8x160xf32>
    tpu.vector_store %arg14[%c0_28, %c0_29], %42 {strides = array<i32>} : memref<8x160xf32, #tpu.memory_space<vmem>>, vector<8x160xf32>,
    %c0_30 = arith.constant 0 : index
    %c0_31 = arith.constant 0 : index
    %44 = vector.load %arg10[%c0_30, %c0_31] : memref<128x160xbf16, #tpu.memory_space<vmem>>, vector<128x160xbf16>
    %cst_32 = arith.constant dense<0.000000e+00> : vector<8x160xf32>
    %45 = tpu.matmul %16, %44, %cst_32 {dimension_numbers = #tpu.dot_dimension_numbers<[1], [0], [0], [1], [0, 0, 1, 1], [], []>} : vector<8x128xbf16>, vector<128x160xbf16>, vector<8x160xf32> -> vector<8x160xf32>
    %c0_33 = arith.constant 0 : index
    %c0_34 = arith.constant 0 : index
    %46 = vector.load %arg11[%c0_33, %c0_34] : memref<1x160xf32, #tpu.memory_space<vmem>>, vector<1x160xf32>
    %47 = vector.broadcast %46 : vector<1x160xf32> to vector<8x160xf32>
    %48 = arith.addf %45, %47 : vector<8x160xf32>
    %c0_35 = arith.constant 0 : index
    %c0_36 = arith.constant 0 : index
    %49 = vector.load %arg13[%c0_35, %c0_36] : memref<8x160xf32, #tpu.memory_space<vmem>>, vector<8x160xf32>
    tpu.vector_store %arg13[%c0_35, %c0_36], %48 {strides = array<i32>} : memref<8x160xf32, #tpu.memory_space<vmem>>, vector<8x160xf32>,
    return
  }
  func.func @transform_0(%arg0: i32) -> (i32, i32) {
    %c0_i32 = arith.constant 0 : i32
    %c0_i32_0 = arith.constant 0 : i32
    return %arg0, %c0_i32 : i32, i32
  }
  func.func @transform_1(%arg0: i32) -> (i32, i32) {
    %c0_i32 = arith.constant 0 : i32
    %c0_i32_0 = arith.constant 0 : i32
    %c0_i32_1 = arith.constant 0 : i32
    return %c0_i32, %c0_i32_0 : i32, i32
  }
  func.func @transform_2(%arg0: i32) -> (i32, i32) {
    %c0_i32 = arith.constant 0 : i32
    %c0_i32_0 = arith.constant 0 : i32
    %c0_i32_1 = arith.constant 0 : i32
    return %c0_i32, %c0_i32_0 : i32, i32
  }
  func.func @transform_3(%arg0: i32) -> (i32, i32) {
    %c0_i32 = arith.constant 0 : i32
    %c0_i32_0 = arith.constant 0 : i32
    %c0_i32_1 = arith.constant 0 : i32
    return %c0_i32, %c0_i32_0 : i32, i32
  }
  func.func @transform_4(%arg0: i32) -> (i32, i32) {
    %c0_i32 = arith.constant 0 : i32
    %c0_i32_0 = arith.constant 0 : i32
    %c0_i32_1 = arith.constant 0 : i32
    return %c0_i32, %c0_i32_0 : i32, i32
  }
  func.func @transform_5(%arg0: i32) -> (i32, i32) {
    %c0_i32 = arith.constant 0 : i32
    %c0_i32_0 = arith.constant 0 : i32
    %c0_i32_1 = arith.constant 0 : i32
    return %c0_i32, %c0_i32_0 : i32, i32
  }
  func.func @transform_6(%arg0: i32) -> (i32, i32) {
    %c0_i32 = arith.constant 0 : i32
    %c0_i32_0 = arith.constant 0 : i32
    %c0_i32_1 = arith.constant 0 : i32
    return %c0_i32, %c0_i32_0 : i32, i32
  }
  func.func @transform_7(%arg0: i32) -> (i32, i32) {
    %c0_i32 = arith.constant 0 : i32
    %c0_i32_0 = arith.constant 0 : i32
    %c0_i32_1 = arith.constant 0 : i32
    return %c0_i32, %c0_i32_0 : i32, i32
  }
  func.func @transform_8(%arg0: i32) -> (i32, i32) {
    %c0_i32 = arith.constant 0 : i32
    %c0_i32_0 = arith.constant 0 : i32
    %c0_i32_1 = arith.constant 0 : i32
    return %c0_i32, %c0_i32_0 : i32, i32
  }
  func.func @transform_9(%arg0: i32) -> (i32, i32) {
    %c0_i32 = arith.constant 0 : i32
    %c0_i32_0 = arith.constant 0 : i32
    %c0_i32_1 = arith.constant 0 : i32
    return %c0_i32, %c0_i32_0 : i32, i32
  }
  func.func @transform_10(%arg0: i32) -> (i32, i32) {
    %c0_i32 = arith.constant 0 : i32
    %c0_i32_0 = arith.constant 0 : i32
    %c0_i32_1 = arith.constant 0 : i32
    return %c0_i32, %c0_i32_0 : i32, i32
  }
  func.func @transform_11(%arg0: i32) -> (i32, i32) {
    %c0_i32 = arith.constant 0 : i32
    %c0_i32_0 = arith.constant 0 : i32
    return %arg0, %c0_i32 : i32, i32
  }
  func.func @transform_12(%arg0: i32) -> (i32, i32) {
    %c0_i32 = arith.constant 0 : i32
    %c0_i32_0 = arith.constant 0 : i32
    return %arg0, %c0_i32 : i32, i32
  }
  func.func @transform_13(%arg0: i32) -> (i32, i32) {
    %c0_i32 = arith.constant 0 : i32
    %c0_i32_0 = arith.constant 0 : i32
    return %arg0, %c0_i32 : i32, i32
  }
}

</mosaic_0001>

<bundles_post_ra>
// kernel: mdn_forward.1
= control target key start
LH: loop header
LB: loop body
LE: loop exit
PB: predicated region body
PF: predicated region fallthrough
CT: control target
= control target key end

     0   :  { %v1140_v2 = vmov 0.0   ;;  %vm1141_vm0 = vmmov 0   ;;  %vm206_vm1 = vcmask 261120   ;;  %s1478_s0 = inlined_call_operand.vmem [shape: bf16[8,288], index: 0, kind: input, shape index: {}]   ;;  %s1479_s1 = inlined_call_operand.vmem [shape: bf16[288,128], index: 1, kind: input, shape index: {}]   ;;  %s1480_s2 = inlined_call_operand.vmem [shape: f32[1,128], index: 2, kind: input, shape index: {}]   ;;  %s1481_s3 = inlined_call_operand.vmem [shape: bf16[128,128], index: 3, kind: input, shape index: {}]   ;;  %s1482_s4 = inlined_call_operand.vmem [shape: f32[1,128], index: 4, kind: input, shape index: {}]   ;;  %s1483_s5 = inlined_call_operand.vmem [shape: bf16[128,5], index: 5, kind: input, shape index: {}]   ;;  %s1484_s6 = inlined_call_operand.vmem [shape: f32[1,5], index: 6, kind: input, shape index: {}]   ;;  %s1485_s7 = inlined_call_operand.vmem [shape: bf16[128,160], index: 7, kind: input, shape index: {}]   ;;  %s1486_s8 = inlined_call_operand.vmem [shape: f32[1,160], index: 8, kind: input, shape index: {}]   ;;  %s1487_s9 = inlined_call_operand.vmem [shape: bf16[128,160], index: 9, kind: input, shape index: {}]   ;;  %s1488_s10 = inlined_call_operand.vmem [shape: f32[1,160], index: 10, kind: input, shape index: {}]   ;;  %s1489_s11 = inlined_call_operand.hbm [shape: f32[8,5], index: 11, kind: output, shape index: {0}]   ;;  %s1490_s12 = inlined_call_operand.vmem [shape: f32[8,160], index: 12, kind: output, shape index: {1}]   ;;  %s1491_s13 = inlined_call_operand.vmem [shape: f32[8,160], index: 13, kind: output, shape index: {2}]  }
   0x1   :  { %v1025_v0 = vld [vmem:[%s1479_s1 + $0x78] sm:$0xff]   ;;  %973 = vmatprep.subr.bf16.mxu1 %v1140_v2  ;;  %v1027_v3 = vld [vmem:[%s1479_s1 + $0x70] sm:$0xff]   ;;  %977 = vmatprep.mubr.msk.bf16.mxu1 %vm1141_vm0, %v1140_v2  ;;  %v1029_v5 = vld [vmem:[%s1479_s1 + $0x68] sm:$0xff]  }
   0x2   :  { %v1026_v1 = vld [vmem:[%s1479_s1 + $0x38] sm:$0xff]   ;;  %930 = vmatprep.subr.bf16.mxu0 %v1025_v0  ;;  %v1028_v4 = vld [vmem:[%s1479_s1 + $0x30] sm:$0xff]   ;;  %v1030_v6 = vld [vmem:[%s1479_s1 + $0x28] sm:$0xff]  }
   0x3   :  { %931 = vmatpush3.bf16.msra.mxu0 %v1026_v1  ;;  %v1031_v7 = vld [vmem:[%s1479_s1 + $0x60] sm:$0xff]   ;;  %v1033_v9 = vld [vmem:[%s1479_s1 + $0x58] sm:$0xff]   ;;  %v1039_v10 = vld [vmem:[%s1479_s1 + $0x88] sm:$0xff]  }
   0x4   :  { %932 = vmatprep.subr.bf16.mxu0 %v1027_v3  ;;  %v1032_v8 = vld [vmem:[%s1479_s1 + $0x20] sm:$0xff]   ;;  %v1034_v11 = vld [vmem:[%s1479_s1 + $0x18] sm:$0xff]   ;;  %v1035_v12 = vld [vmem:[%s1479_s1 + $0x50] sm:$0xff]   ;;  %974 = vmatpush3.bf16.msra.mxu1 %v1039_v10 }
   0x5   :  { %v1036_v13 = vld [vmem:[%s1479_s1 + $0x10] sm:$0xff]   ;;  %975 = vmatprep.subr.bf16.mxu1 %v1140_v2  ;;  %v1042_v14 = vld [vmem:[%s1479_s1 + $0x80] sm:$0xff]   ;;  %v1037_v15 = vld [vmem:[%s1479_s1 + $0x48] sm:$0xff]  }
   0x6   :  { %v43_v16 = vld [vmem:[%s1478_s0] sm:$0xff]  ;;  %v1045_v18 = vld [vmem:[%s1478_s0 + $0x8] ss:$0 sps:$4 sm:$0xff]   ;;  %v1046_v19 = vld [vmem:[%s1481_s3 + $0x38] sm:$0xff]  }
   0x7   :  { %933 = vmatpush3.bf16.msra.mxu0 %v1028_v4  ;;  %v859_v17 = vcombine.high %v43_v16, %v43_v16  ;;  %v1038_v20 = vld [vmem:[%s1479_s1 + $0x8] sm:$0xff]   ;;  %v1040_v21 = vld [vmem:[%s1479_s1 + $0x40] sm:$0xff]   ;;  %v1047_v22 = vld [vmem:[%s1481_s3 + $0x30] sm:$0xff]   ;;  %v858_v25 = vcombine.low %v43_v16, %v43_v16 }
   0x8   :  { %934 = vmatprep.subr.bf16.mxu0 %v1029_v5  ;;  %976 = vmatpush3.bf16.msra.mxu1 %v1042_v14  ;;  %v1041_v23 = vld [vmem:[%s1479_s1] sm:$0xff]   ;;  %v1048_v24 = vld [vmem:[%s1481_s3 + $0x28] sm:$0xff]   ;;  %v1050_v27 = vld [vmem:[%s1481_s3 + $0x18] sm:$0xff]  }
   0x9   :  { %242 = vmatprep.mubr.bf16.mxu0 %v859_v17  ;;  %981 = vmatprep.subr.bf16.mxu1 %v1140_v2  ;;  %v1049_v26 = vld [vmem:[%s1481_s3 + $0x20] sm:$0xff]  }
   0xb   :  { %935 = vmatpush3.bf16.msra.mxu0 %v1030_v6  ;;  %978 = vmatmul.mubr.msk.bf16.vlgmr.msra.gmra.mxu1 %vm206_vm1, %v1045_v18 }
   0xc   :  { %936 = vmatprep.subr.bf16.mxu0 %v1031_v7  ;;  %982 = vmatpush3.bf16.msra.mxu1 %v1046_v19 }
   0xd   :  { %983 = vmatprep.subr.bf16.mxu1 %v1140_v2  ;;  %997 = vmatprep.mubr.msk.bf16.mxu1 %vm1141_vm0, %v1140_v2 }
   0xf   :  { %937 = vmatpush3.bf16.msra.mxu0 %v1032_v8 }
  0x10   :  { %938 = vmatprep.subr.bf16.mxu0 %v1033_v9  ;;  %984 = vmatpush3.bf16.msra.mxu1 %v1047_v22 }
  0x11   :  { %985 = vmatprep.subr.bf16.mxu1 %v1140_v2 }
  0x13   :  { %939 = vmatpush3.bf16.msra.mxu0 %v1034_v11 }
  0x14   :  { %940 = vmatprep.subr.bf16.mxu0 %v1035_v12  ;;  %986 = vmatpush3.bf16.msra.mxu1 %v1048_v24 }
  0x15   :  { %987 = vmatprep.subr.bf16.mxu1 %v1140_v2 }
  0x17   :  { %941 = vmatpush3.bf16.msra.mxu0 %v1036_v13 }
  0x18   :  { %942 = vmatprep.subr.bf16.mxu0 %v1037_v15  ;;  %988 = vmatpush3.bf16.msra.mxu1 %v1049_v26 }
  0x19   :  { %989 = vmatprep.subr.bf16.mxu1 %v1140_v2 }
  0x1b   :  { %943 = vmatpush3.bf16.msra.mxu0 %v1038_v20 }
  0x1c   :  { %944 = vmatprep.subr.bf16.mxu0 %v1040_v21  ;;  %990 = vmatpush3.bf16.msra.mxu1 %v1050_v27 }
  0x1d   :  { %991 = vmatprep.subr.bf16.mxu1 %v1140_v2 }
  0x1f   :  { %945 = vmatpush3.bf16.msra.mxu0 %v1041_v23 }
  0x20   :  { %1001 = vmatprep.subr.bf16.mxu0 %v1140_v2 }
  0x22   :  { %243 = vmatmul.mubr.bf16.vlgmr.msra.gmra.mxu0 %v858_v25 }
  0x23   :  { %1017 = vmatprep.mubr.msk.bf16.mxu0 %vm1141_vm0, %v1140_v2 }
  0x24   :  { %19 = vsyncpa [#allocation3], 0  ;;  %v1051_v28 = vld [vmem:[%s1481_s3 + $0x10] sm:$0xff]   ;;  %v1052_v29 = vld [vmem:[%s1481_s3 + $0x8] sm:$0xff]   ;;  %v1142_v6 = vmov 0   ;;  %vm516_vm2 = vcmask 39936  }
  0x25   :  { %992 = vmatpush3.bf16.msra.mxu1 %v1051_v28  ;;  %v1053_v30 = vld [vmem:[%s1481_s3] sm:$0xff]   ;;  %v1054_v31 = vld [vmem:[%s1483_s5 + $0x38] sm:$0xff]   ;;  %v1058_v33 = vld [vmem:[%s1483_s5 + $0x30] sm:$0xff]  }
  0x26   :  { %993 = vmatprep.subr.bf16.mxu1 %v1140_v2  ;;  %v1057_v32 = vld [vmem:[%s1485_s7 + $0x74] ss:$8 sps:$4 sm:$0xff]   ;;  %1002 = vmatpush3.bf16.msra.mxu0 %v1054_v31  ;;  %v1062_v34 = vld [vmem:[%s1483_s5 + $0x28] sm:$0xff]   ;;  %v1066_v35 = vld [vmem:[%s1483_s5 + $0x20] sm:$0xff]  }
  0x27   :  { %1003 = vmatprep.subr.bf16.mxu0 %v1140_v2  ;;  %v1070_v36 = vld [vmem:[%s1483_s5 + $0x18] sm:$0xff]   ;;  %v1074_v37 = vld [vmem:[%s1483_s5 + $0x10] sm:$0xff]   ;;  %v1078_v38 = vld [vmem:[%s1483_s5 + $0x8] sm:$0xff]  }
  0x28   :  { %v857_v44 = vld [vmem:[%s1480_s2] ss:$0 sm:$0xff]  ;;  %v1055_v52 = vld [vmem:[%s1485_s7 + $0x70] ss:$8 sps:$4 sm:$0xff]   ;;  %v1061_v54 = vld [vmem:[%s1485_s7 + $0x64] ss:$8 sps:$4 sm:$0xff]  }
  0x29   :  { %994 = vmatpush3.bf16.msra.mxu1 %v1052_v29  ;;  %v1059_v55 = vld [vmem:[%s1485_s7 + $0x60] ss:$8 sps:$4 sm:$0xff]   ;;  %v1065_v56 = vld [vmem:[%s1485_s7 + $0x54] ss:$8 sps:$4 sm:$0xff]   ;;  %v1063_v57 = vld [vmem:[%s1485_s7 + $0x50] ss:$8 sps:$4 sm:$0xff]  }
  0x2a   :  { %995 = vmatprep.subr.bf16.mxu1 %v1140_v2  ;;  %1004 = vmatpush3.bf16.msra.mxu0 %v1058_v33  ;;  %v1069_v58 = vld [vmem:[%s1485_s7 + $0x44] ss:$8 sps:$4 sm:$0xff]   ;;  %v1067_v59 = vld [vmem:[%s1485_s7 + $0x40] ss:$8 sps:$4 sm:$0xff]   ;;  %v1073_v60 = vld [vmem:[%s1485_s7 + $0x34] ss:$8 sps:$4 sm:$0xff]  }
  0x2b   :  { %1005 = vmatprep.subr.bf16.mxu0 %v1140_v2  ;;  %v1071_v61 = vld [vmem:[%s1485_s7 + $0x30] ss:$8 sps:$4 sm:$0xff]   ;;  %v1077_v62 = vld [vmem:[%s1485_s7 + $0x24] ss:$8 sps:$4 sm:$0xff]   ;;  %v1075_v63 = vld [vmem:[%s1485_s7 + $0x20] ss:$8 sps:$4 sm:$0xff]  }
  0x2c   :  { %v1081_v0 = vld [vmem:[%s1485_s7 + $0x14] ss:$8 sps:$4 sm:$0xff]   ;;  %v1079_v1 = vld [vmem:[%s1485_s7 + $0x10] ss:$8 sps:$4 sm:$0xff]   ;;  %v1085_v3 = vld [vmem:[%s1485_s7 + $0x4] ss:$8 sps:$4 sm:$0xff]  }
  0x2d   :  { %996 = vmatpush3.bf16.msra.mxu1 %v1053_v30  ;;  %v1083_v4 = vld [vmem:[%s1485_s7] ss:$8 sps:$4 sm:$0xff]   ;;  %v1088_v5 = vld [vmem:[%s1487_s9 + $0x74] ss:$8 sps:$4 sm:$0xff]   ;;  %v1086_v13 = vld [vmem:[%s1487_s9 + $0x70] ss:$8 sps:$4 sm:$0xff]   ;;  %v547_v30 = vlaneseq }
  0x2e   :  { %637 = vmatprep.subr.bf16.mxu1 %v1057_v32  ;;  %1006 = vmatpush3.bf16.msra.mxu0 %v1062_v34  ;;  %v880_v7 = vld [vmem:[%s1482_s4] ss:$0 sm:$0xff]  ;;  %v1091_v15 = vld [vmem:[%s1487_s9 + $0x64] ss:$8 sps:$4 sm:$0xff]   ;;  %v1094_v18 = vld [vmem:[%s1487_s9 + $0x54] ss:$8 sps:$4 sm:$0xff]  }
  0x2f   :  { %1007 = vmatprep.subr.bf16.mxu0 %v1140_v2  ;;  %v1089_v17 = vld [vmem:[%s1487_s9 + $0x60] ss:$8 sps:$4 sm:$0xff]   ;;  %v1092_v19 = vld [vmem:[%s1487_s9 + $0x50] ss:$8 sps:$4 sm:$0xff]   ;;  %v1097_v20 = vld [vmem:[%s1487_s9 + $0x44] ss:$8 sps:$4 sm:$0xff]  }
  0x30   :  { %v1095_v21 = vld [vmem:[%s1487_s9 + $0x40] ss:$8 sps:$4 sm:$0xff]   ;;  %v1100_v22 = vld [vmem:[%s1487_s9 + $0x34] ss:$8 sps:$4 sm:$0xff]   ;;  %v1098_v23 = vld [vmem:[%s1487_s9 + $0x30] ss:$8 sps:$4 sm:$0xff]  }
  0x31   :  { %v1103_v24 = vld [vmem:[%s1487_s9 + $0x24] ss:$8 sps:$4 sm:$0xff]   ;;  %v1101_v25 = vld [vmem:[%s1487_s9 + $0x20] ss:$8 sps:$4 sm:$0xff]   ;;  %v1106_v26 = vld [vmem:[%s1487_s9 + $0x14] ss:$8 sps:$4 sm:$0xff]  }
  0x32   :  { %1008 = vmatpush3.bf16.msra.mxu0 %v1066_v35  ;;  %v1104_v27 = vld [vmem:[%s1487_s9 + $0x10] ss:$8 sps:$4 sm:$0xff]   ;;  %v1109_v28 = vld [vmem:[%s1487_s9 + $0x4] ss:$8 sps:$4 sm:$0xff]   ;;  %v1107_v29 = vld [vmem:[%s1487_s9] ss:$8 sps:$4 sm:$0xff]  }
  0x33   :  { %1009 = vmatprep.subr.bf16.mxu0 %v1140_v2  ;;  %v548_v31 = vshrl.u32 %v547_v30, 7  ;;  %v545_v33 = vld [vmem:[%s1486_s8] sm:$0x3] }
  0x35   :  { %v549_v32 = vsub.s32 0, %v548_v31  ;;  %v553_v34 = vsub.s32 1, %v548_v31 }
  0x36   :  { %1010 = vmatpush3.bf16.msra.mxu0 %v1070_v36  ;;  %v889_v36 = vld [vmem:[%s1484_s6] ss:$0 sm:$0xff] }
  0x37   :  { %1011 = vmatprep.subr.bf16.mxu0 %v1140_v2  ;;  %v550_v35 = vrot.slane %v545_v33, %v549_v32 }
  0x3a   :  { %1012 = vmatpush3.bf16.msra.mxu0 %v1074_v37  ;;  %v554_v37 = vrot.slane %v545_v33, %v553_v34 }
  0x3b   :  { %1013 = vmatprep.subr.bf16.mxu0 %v1140_v2 }
  0x3e   :  { %1014 = vmatpush3.bf16.msra.mxu0 %v1078_v38 }
  0x3f   :  { %1015 = vmatprep.subr.bf16.mxu0 %v1140_v2  ;;  %v1082_v2 = vld [vmem:[%s1483_s5] sm:$0xff]  }
  0x42   :  { %1016 = vmatpush3.bf16.msra.mxu0 %v1082_v2 }
  0x43   :  { %792 = vmatprep.subr.bf16.mxu0 %v1088_v5 }
  0xcb   :  { %v284_v39 = vpop.f32.mrf.mxu1 }
  0xcd   :  { %v979_v40 = vpop.f32.mrf.mxu1 }
  0xcf   :  { %v287_v41 = vpop.f32.mrf.mxu1 }
  0xd1   :  { %v980_v42 = vpop.f32.mrf.mxu1 }
  0xe2   :  { %v946_v43 = vpop.f32.mrf.mxu0 }
  0xe4   :  { %v947_v45 = vpop.f32.mrf.mxu0 }
  0xe5   :  { %v948_v46 = vadd.f32 %v947_v45, %v946_v43 }
  0xe6   :  { %v949_v47 = vpop.f32.mrf.mxu0 }
  0xe7   :  { %v245_v48 = vadd.f32 %v948_v46, %v857_v44 }
  0xe8   :  { %v950_v49 = vpop.f32.mrf.mxu0 }
  0xe9   :  { %v285_v50 = vadd.f32 %v284_v39, %v245_v48 }
  0xeb   :  { %v290_v51 = vmax.f32 %v285_v50, 0.0 }
  0xed   :  { %v291_v53 = vpack.c.bf16 %v290_v51, %v290_v51 }
  0xef   :  { %998 = vmatmul.mubr.bf16.vlgmr.msra.gmra.mxu1 %v291_v53 }
  0xf0   :  { %638 = vmatpush1.bf16.msra.mxu1 %v1055_v52  ;;  %669 = vmatprep.mubr.bf16.mxu1 %v1142_v6 }
  0xf1   :  { %639 = vmatprep.subr.bf16.mxu1 %v1061_v54  ;;  %v700_v54 = vld [vmem:[%s1488_s10] sm:$0x3]  ;;  %s1143_s10 = smov [#allocation2]  }
  0xf4   :  { %640 = vmatpush1.bf16.msra.mxu1 %v1059_v55  ;;  %v705_v55 = vrot.slane %v700_v54, %v549_v32 }
  0xf5   :  { %641 = vmatprep.subr.bf16.mxu1 %v1065_v56  ;;  %v709_v56 = vrot.slane %v700_v54, %v553_v34 }
  0xf8   :  { %642 = vmatpush1.bf16.msra.mxu1 %v1063_v57 }
  0xf9   :  { %643 = vmatprep.subr.bf16.mxu1 %v1069_v58 }
  0xfc   :  { %644 = vmatpush1.bf16.msra.mxu1 %v1067_v59 }
  0xfd   :  { %645 = vmatprep.subr.bf16.mxu1 %v1073_v60 }
 0x100   :  { %646 = vmatpush1.bf16.msra.mxu1 %v1071_v61 }
 0x101   :  { %647 = vmatprep.subr.bf16.mxu1 %v1077_v62 }
 0x104   :  { %648 = vmatpush1.bf16.msra.mxu1 %v1075_v63 }
 0x105   :  { %649 = vmatprep.subr.bf16.mxu1 %v1081_v0 }
 0x108   :  { %650 = vmatpush1.bf16.msra.mxu1 %v1079_v1 }
 0x109   :  { %651 = vmatprep.subr.bf16.mxu1 %v1085_v3 }
 0x10c   :  { %652 = vmatpush1.bf16.msra.mxu1 %v1083_v4 }
 0x1af   :  { %v397_v8 = vpop.f32.mrf.mxu1 }
 0x1b0   :  { %v398_v9 = vadd.f32 %v880_v7, %v397_v8 }
 0x1b1   :  { %v999_v10 = vpop.f32.mrf.mxu1 }
 0x1b2   :  { %v403_v11 = vmax.f32 %v398_v9, 0.0 }
 0x1b3   :  { %v400_v12 = vpop.f32.mrf.mxu1 }
 0x1b4   :  { %v404_v14 = vpack.c.bf16 %v403_v11, %v403_v11 }
 0x1b5   :  { %v1000_v16 = vpop.f32.mrf.mxu1 }
 0x1b6   :  { %1018 = vmatmul.mubr.bf16.vlgmr.msra.gmra.mxu0 %v404_v14  ;;  %670 = vmatmul.mubr.bf16.vlgmr.msra.gmra.mxu1 %v404_v14 }
 0x1b7   :  { %793 = vmatpush1.bf16.msra.mxu0 %v1086_v13  ;;  %824 = vmatprep.mubr.bf16.mxu0 %v1142_v6 }
 0x1b8   :  { %794 = vmatprep.subr.bf16.mxu0 %v1091_v15 }
 0x1bb   :  { %795 = vmatpush1.bf16.msra.mxu0 %v1089_v17 }
 0x1bc   :  { %796 = vmatprep.subr.bf16.mxu0 %v1094_v18 }
 0x1bf   :  { %797 = vmatpush1.bf16.msra.mxu0 %v1092_v19 }
 0x1c0   :  { %798 = vmatprep.subr.bf16.mxu0 %v1097_v20 }
 0x1c3   :  { %799 = vmatpush1.bf16.msra.mxu0 %v1095_v21 }
 0x1c4   :  { %800 = vmatprep.subr.bf16.mxu0 %v1100_v22 }
 0x1c7   :  { %801 = vmatpush1.bf16.msra.mxu0 %v1098_v23 }
 0x1c8   :  { %802 = vmatprep.subr.bf16.mxu0 %v1103_v24 }
 0x1cb   :  { %803 = vmatpush1.bf16.msra.mxu0 %v1101_v25 }
 0x1cc   :  { %804 = vmatprep.subr.bf16.mxu0 %v1106_v26 }
 0x1cf   :  { %805 = vmatpush1.bf16.msra.mxu0 %v1104_v27 }
 0x1d0   :  { %806 = vmatprep.subr.bf16.mxu0 %v1109_v28 }
 0x1d3   :  { %807 = vmatpush1.bf16.msra.mxu0 %v1107_v29 }
 0x1d6   :  { %825 = vmatmul.mubr.bf16.vlgmr.msra.gmra.mxu0 %v404_v14 }
 0x276   :  { %v510_v38 = vpop.f32.mrf.mxu0  ;;  %v671_v39 = vpop.f32.mrf.mxu1 }
 0x277   :  { %v511_v40 = vadd.f32 %v889_v36, %v510_v38  ;;  %v672_v41 = vadd.f32 %v671_v39, %v550_v35 }
 0x278   :  { %v1019_v42 = vpop.f32.mrf.mxu0  ;;  %v673_v43 = vpop.f32.mrf.mxu1 }
 0x279   :  { %v678_v44 = vmul.f32 1.442695, %v672_v41  ;;  %v674_v45 = vadd.f32 %v673_v43, %v554_v37  ;;  %v517_v46 = vsel %vm516_vm2, %v511_v40, -inf }
 0x27a   :  { %518 = vmax.xlane.f32.xlu0 %v517_v46  ;;  %v513_v47 = vpop.f32.mrf.mxu0  ;;  %v675_v48 = vpop.f32.mrf.mxu1 }
 0x27b   :  { %1110 = vpow2.f32 %v678_v44  ;;  %v680_v49 = vmul.f32 1.442695, %v674_v45 }
 0x27c   :  { %v1020_v50 = vpop.f32.mrf.mxu0  ;;  %v676_v51 = vpop.f32.mrf.mxu1 }
 0x27d   :  { %1112 = vpow2.f32 %v680_v49 }
 0x288   :  { %v1111_v52 = vpop.eup %1110 }
 0x289   :  { %682 = vst [vmem:[%s1491_s13] sm:$0xff] %v1111_v52 }
 0x28a   :  { %v1113_v53 = vpop.eup %1112 }
 0x28b   :  { %683 = vst.msk [vmem:[%s1491_s13 + $0x8] sm:$0xff] %vm206_vm1, %v1113_v53  ;;  %s841_s13 = sshll.u32 %s1143_s10, 4  ;;  %s842_s13 = int_to_ptr.vmem [resolvable:$true] %s841_s13 }
 0x28c   :  { %s1118_s15 = scalar_lea.vmem %s842_s13, 128  ;;  %p1123_p1 = scmp.lt.s32.totalorder %s842_s13, %s842_s13 }
 0x28d   :  { %p1119_p0 = scmp.ne.s32.totalorder %s842_s13, %s1118_s15  ;;  %p1124_p2 = scmp.lt.s32.totalorder %s1118_s15, %s1118_s15 }
 0x28f   :  { %p1125_p3 = por %p1124_p2, %p1123_p1 }
 0x291   :  { %p1126_p4 = pnand %p1125_p3, %p1119_p0 }
 0x296   :  { %v826_v57 = vpop.f32.mrf.mxu0 }
 0x297   :  { %v827_v58 = vadd.f32 %v826_v57, %v705_v55 }
 0x298   :  { %v828_v59 = vpop.f32.mrf.mxu0 }
 0x299   :  { %833 = vst [vmem:[%s1490_s12] sm:$0xff] %v827_v58  ;;  %v829_v60 = vadd.f32 %v828_v59, %v709_v56 }
 0x29a   :  { %v830_v61 = vpop.f32.mrf.mxu0 }
 0x29b   :  { %834 = vst.msk [vmem:[%s1490_s12 + $0x8] sm:$0xff] %vm206_vm1, %v829_v60 }
 0x29c   :  { %v831_v62 = vpop.f32.mrf.mxu0 }
 0x303   :  { %v519_v63 = vpop.xlane.xlu0 %518 }
 0x304   :  { %v520_v0 = vsub.f32 %v511_v40, %v519_v63 }
 0x306   :  { %v521_v1 = vmul.f32 1.442695, %v520_v0 }
 0x308   :  { %1114 = vpow2.f32 %v521_v1 }
 0x315   :  { %v1115_v2 = vpop.eup %1114 }
 0x316   :  { %v523_v3 = vsel %vm516_vm2, %v1115_v2, 0.0 }
 0x317   :  { %524 = vadd.xlane.f32.xlu0 %v523_v3 }
 0x3a0   :  { %v525_v4 = vpop.xlane.xlu0 %524 }
 0x3a1   :  { %1116 = vrcp.f32 %v525_v4 }
 0x3ae   :  { %v1117_v5 = vpop.eup %1116 }
 0x3af   :  { %v527_v6 = vmul.f32 %v1117_v5, %v1115_v2 }
 0x3b1   :  { %528 = vst.msk [vmem:[#allocation2] sm:$0xff] %vm516_vm2, %v527_v6 }
 0x3b2   :  { %1129 = shalt.err (!%p1126_p4)
}
 0x3b3   :  { %844 = dma.vmem_to_hbm [thread:$0]  %s842_s13, 128, %s1489_s11, [#allocation3]  }
 0x3b4   :  { %1138 = dma.done.wait [#allocation3], 128  }
 0x3b5   :  { %1139 = vsyncadd [#allocation3], 4294967168 }
 0x3b6   :  { %856 = vsyncpa [#allocation3], 1 }

</bundles_post_ra>
